<compile_context>
chip_gen: v7x
topology: tpu7x:2x2x1
jax: 0.10.0
libtpu: 0.0.40
codegen_flags: <defaults>
</compile_context>

<pallas_src>
import functools

import jax
import jax.numpy as jnp
from jax.experimental import pallas as pl
from jax.experimental.pallas import tpu as pltpu


def _my_bn_kernel(x_ref, gain_ref, bias_ref, out_ref, mean_ref, var_ref,
                  *, eps, inv_count):
    """Blocks: x/out (N, cb, HW); gain/bias (N, cb, 1); mean/var (1, cb, 1)."""
    x = x_ref[...]
    xf = x.astype(jnp.float32)

    # Per-channel reduction: lane reduce over HW (axis 2), then sum over the
    # batch axis (axis 0).  Accumulation stays in f32.
    s1 = jnp.sum(jnp.sum(xf, axis=2, keepdims=True), axis=0, keepdims=True)
    s2 = jnp.sum(jnp.sum(xf * xf, axis=2, keepdims=True), axis=0, keepdims=True)

    m = s1 * inv_count                    # (1, cb, 1) f32
    var = s2 * inv_count - m * m          # (1, cb, 1) f32

    # Match manual_bn: cast stats back to x.dtype before fused_bn.
    m = m.astype(x.dtype)
    var = var.astype(x.dtype)
    mean_ref[...] = m
    var_ref[...] = var

    # fused_bn
    scale = jax.lax.rsqrt(var + eps) * gain_ref[...]   # (N, cb, 1)
    shift = m * scale - bias_ref[...]                  # (N, cb, 1)
    out_ref[...] = x * scale - shift                   # (N, cb, HW)


def _choose_c_block(N, C, HW, itemsize, budget_bytes=40 * 1024 * 1024):
    """Pick a channel block size whose pipelined footprint fits the budget.

    Budget is conservative for v7x (64 MiB VMEM/TC): double-buffered input +
    output blocks plus worst-case f32 upcast temporaries for the reduction.
    """
    def footprint(cb):
        blk = N * cb * HW * itemsize
        f32_tmp = 2 * N * cb * HW * 4              # worst-case upcast temps
        small = 4 * N * cb * itemsize + 2 * cb * 4  # gain/bias/stats blocks
        return 4 * blk + f32_tmp + small           # in+out, 2-deep buffering

    if footprint(C) <= budget_bytes:
        return C
    # Largest multiple-of-8 divisor of C that fits (keeps tiling constraints).
    best = None
    for cb in range(8, C, 8):
        if C % cb == 0 and footprint(cb) <= budget_bytes:
            best = cb
    if best is not None:
        return best
    # Nothing fits comfortably: take the smallest multiple-of-8 divisor.
    for cb in range(8, C, 8):
        if C % cb == 0:
            return cb
    # TODO(synk): for extreme shapes (no usable channel divisor) add a second
    # "arbitrary" grid axis over N*HW chunks with f32 sum/sum-sq scratch.
    return C


def my_bn_forward(x, gain, bias, stored_mean, stored_var,
                  eps=1e-5, momentum=0.1):
    """Training-mode forward of myBN.

    x:     (N, C, H, W)
    gain:  (N, C, 1, 1) or (1, C, 1, 1)
    bias:  (N, C, 1, 1) or (1, C, 1, 1)
    Returns (out NCHW, new_stored_mean (C,), new_stored_var (C,)).
    """
    N, C, H, W = x.shape
    HW = H * W
    itemsize = jnp.dtype(x.dtype).itemsize

    # Free, contiguous views — no transpose passes over HBM.
    xk = x.reshape(N, C, HW)
    gk = jnp.broadcast_to(gain.reshape(gain.shape[0], C, 1), (N, C, 1)).astype(x.dtype)
    bk = jnp.broadcast_to(bias.reshape(bias.shape[0], C, 1), (N, C, 1)).astype(x.dtype)

    c_blk = _choose_c_block(N, C, HW, itemsize)
    grid = (C // c_blk,)

    out_k, mean_k, var_k = pl.pallas_call(
        functools.partial(_my_bn_kernel, eps=eps, inv_count=1.0 / (N * HW)),
        out_shape=(
            jax.ShapeDtypeStruct((N, C, HW), x.dtype),
            jax.ShapeDtypeStruct((1, C, 1), x.dtype),
            jax.ShapeDtypeStruct((1, C, 1), x.dtype),
        ),
        grid=grid,
        in_specs=[
            pl.BlockSpec((N, c_blk, HW), lambda c: (0, c, 0)),
            pl.BlockSpec((N, c_blk, 1), lambda c: (0, c, 0)),
            pl.BlockSpec((N, c_blk, 1), lambda c: (0, c, 0)),
        ],
        out_specs=(
            pl.BlockSpec((N, c_blk, HW), lambda c: (0, c, 0)),
            pl.BlockSpec((1, c_blk, 1), lambda c: (0, c, 0)),
            pl.BlockSpec((1, c_blk, 1), lambda c: (0, c, 0)),
        ),
        compiler_params=pltpu.CompilerParams(
            dimension_semantics=("parallel",),
            vmem_limit_bytes=64 * 1024 * 1024,
        ),
    )(xk, gk, bk)

    out = out_k.reshape(N, C, H, W)                      # free reshape
    mean = mean_k.reshape(C).astype(stored_mean.dtype)
    var = var_k.reshape(C).astype(stored_var.dtype)

    # Buffer momentum update (glue; matches accumulate_standing == False).
    new_mean = stored_mean * (1.0 - momentum) + mean * momentum
    new_var = stored_var * (1.0 - momentum) + var * momentum
    return out, new_mean, new_var


def _reference(x, gain, bias, eps=1e-5):
    xf = x.astype(jnp.float32)
    m = jnp.mean(xf, axis=(0, 2, 3), keepdims=True)
    m2 = jnp.mean(xf * xf, axis=(0, 2, 3), keepdims=True)
    var = (m2 - m * m).astype(x.dtype)
    m = m.astype(x.dtype)
    scale = jax.lax.rsqrt(var + eps) * gain
    shift = m * scale - bias
    return x * scale - shift, m.reshape(-1), var.reshape(-1)


if __name__ == "__main__":
    key = jax.random.PRNGKey(0)
    kx, kg, kb = jax.random.split(key, 3)

    N, C, H, W = 2, 4, 16, 16
    x = jax.random.normal(kx, (N, C, H, W), dtype=jnp.float32)
    gain = 1.0 + 0.1 * jax.random.normal(kg, (N, C, 1, 1), dtype=jnp.float32)
    bias = 0.1 * jax.random.normal(kb, (N, C, 1, 1), dtype=jnp.float32)

    # buffers as in myBN.__init__
    stored_mean = jnp.zeros((C,), dtype=jnp.float32)
    stored_var = jnp.ones((C,), dtype=jnp.float32)

    out, new_mean, new_var = my_bn_forward(x, gain, bias, stored_mean, stored_var)
    jax.block_until_ready((out, new_mean, new_var))

    # sanity check against plain-JAX reference
    ref_out, ref_m, ref_v = _reference(x, gain, bias)
    assert jnp.allclose(out, ref_out, atol=1e-5, rtol=1e-5)
    assert jnp.allclose(new_mean, stored_mean * 0.9 + ref_m * 0.1, atol=1e-6)
    assert jnp.allclose(new_var, stored_var * 0.9 + ref_v * 0.1, atol=1e-6)

    print("KERNEL_OK")
</pallas_src>

<mosaic_0001>
module attributes {stable_mosaic.version = 11 : i64} {
  func.func @_my_bn_kernel(%arg0: i32, %arg1: memref<2x4x256xf32, #tpu.memory_space<vmem>>, %arg2: memref<2x4x1xf32, #tpu.memory_space<vmem>>, %arg3: memref<2x4x1xf32, #tpu.memory_space<vmem>>, %arg4: memref<2x4x256xf32, #tpu.memory_space<vmem>>, %arg5: memref<1x4x1xf32, #tpu.memory_space<vmem>>, %arg6: memref<1x4x1xf32, #tpu.memory_space<vmem>>) attributes {dimension_semantics = [#tpu.dimension_semantics<parallel>], iteration_bounds = array<i64: 1>, scalar_prefetch = 0 : i64, scratch_operands = 0 : i64, tpu.core_type = #tpu.core_type<tc>, window_params = [{transform_indices = @transform_0, window_bounds = array<i64: 2, 4, 256>}, {transform_indices = @transform_1, window_bounds = array<i64: 2, 4, 1>}, {transform_indices = @transform_2, window_bounds = array<i64: 2, 4, 1>}, {transform_indices = @transform_3, window_bounds = array<i64: 2, 4, 256>}, {transform_indices = @transform_4, window_bounds = array<i64: 1, 4, 1>}, {transform_indices = @transform_5, window_bounds = array<i64: 1, 4, 1>}]} {
    %c0 = arith.constant 0 : index
    %c0_0 = arith.constant 0 : index
    %c0_1 = arith.constant 0 : index
    %0 = vector.load %arg1[%c0, %c0_0, %c0_1] : memref<2x4x256xf32, #tpu.memory_space<vmem>>, vector<2x4x256xf32>
    %cst = arith.constant dense<0.000000e+00> : vector<2x4xf32>
    %1 = vector.multi_reduction <add>, %0, %cst [2] : vector<2x4x256xf32> to vector<2x4xf32>
    %2 = vector.shape_cast %1 : vector<2x4xf32> to vector<2x4x1xf32>
    %cst_2 = arith.constant dense<0.000000e+00> : vector<4x1xf32>
    %3 = vector.multi_reduction <add>, %2, %cst_2 [0] : vector<2x4x1xf32> to vector<4x1xf32>
    %4 = vector.shape_cast %3 : vector<4x1xf32> to vector<1x4x1xf32>
    %5 = arith.mulf %0, %0 : vector<2x4x256xf32>
    %cst_3 = arith.constant dense<0.000000e+00> : vector<2x4xf32>
    %6 = vector.multi_reduction <add>, %5, %cst_3 [2] : vector<2x4x256xf32> to vector<2x4xf32>
    %7 = vector.shape_cast %6 : vector<2x4xf32> to vector<2x4x1xf32>
    %cst_4 = arith.constant dense<0.000000e+00> : vector<4x1xf32>
    %8 = vector.multi_reduction <add>, %7, %cst_4 [0] : vector<2x4x1xf32> to vector<4x1xf32>
    %9 = vector.shape_cast %8 : vector<4x1xf32> to vector<1x4x1xf32>
    %cst_5 = arith.constant 0.001953125 : f32
    %10 = vector.broadcast %cst_5 : f32 to vector<1x4x1xf32>
    %11 = arith.mulf %4, %10 : vector<1x4x1xf32>
    %cst_6 = arith.constant 0.001953125 : f32
    %12 = vector.broadcast %cst_6 : f32 to vector<1x4x1xf32>
    %13 = arith.mulf %9, %12 : vector<1x4x1xf32>
    %14 = arith.mulf %11, %11 : vector<1x4x1xf32>
    %15 = arith.subf %13, %14 : vector<1x4x1xf32>
    %c0_7 = arith.constant 0 : index
    %c0_8 = arith.constant 0 : index
    %c0_9 = arith.constant 0 : index
    %16 = vector.load %arg5[%c0_7, %c0_8, %c0_9] : memref<1x4x1xf32, #tpu.memory_space<vmem>>, vector<1x4x1xf32>
    tpu.vector_store %arg5[%c0_7, %c0_8, %c0_9], %11 {strides = array<i32>} : memref<1x4x1xf32, #tpu.memory_space<vmem>>, vector<1x4x1xf32>,
    %c0_10 = arith.constant 0 : index
    %c0_11 = arith.constant 0 : index
    %c0_12 = arith.constant 0 : index
    %17 = vector.load %arg6[%c0_10, %c0_11, %c0_12] : memref<1x4x1xf32, #tpu.memory_space<vmem>>, vector<1x4x1xf32>
    tpu.vector_store %arg6[%c0_10, %c0_11, %c0_12], %15 {strides = array<i32>} : memref<1x4x1xf32, #tpu.memory_space<vmem>>, vector<1x4x1xf32>,
    %cst_13 = arith.constant 9.99999974E-6 : f32
    %18 = vector.broadcast %cst_13 : f32 to vector<1x4x1xf32>
    %19 = arith.addf %15, %18 : vector<1x4x1xf32>
    %20 = math.rsqrt %19 : vector<1x4x1xf32>
    %c0_14 = arith.constant 0 : index
    %c0_15 = arith.constant 0 : index
    %c0_16 = arith.constant 0 : index
    %21 = vector.load %arg2[%c0_14, %c0_15, %c0_16] : memref<2x4x1xf32, #tpu.memory_space<vmem>>, vector<2x4x1xf32>
    %22 = vector.broadcast %20 : vector<1x4x1xf32> to vector<2x4x1xf32>
    %23 = arith.mulf %22, %21 : vector<2x4x1xf32>
    %24 = vector.broadcast %11 : vector<1x4x1xf32> to vector<2x4x1xf32>
    %25 = arith.mulf %24, %23 : vector<2x4x1xf32>
    %c0_17 = arith.constant 0 : index
    %c0_18 = arith.constant 0 : index
    %c0_19 = arith.constant 0 : index
    %26 = vector.load %arg3[%c0_17, %c0_18, %c0_19] : memref<2x4x1xf32, #tpu.memory_space<vmem>>, vector<2x4x1xf32>
    %27 = arith.subf %25, %26 : vector<2x4x1xf32>
    %28 = vector.broadcast %23 : vector<2x4x1xf32> to vector<2x4x256xf32>
    %29 = arith.mulf %0, %28 : vector<2x4x256xf32>
    %30 = vector.broadcast %27 : vector<2x4x1xf32> to vector<2x4x256xf32>
    %31 = arith.subf %29, %30 : vector<2x4x256xf32>
    %c0_20 = arith.constant 0 : index
    %c0_21 = arith.constant 0 : index
    %c0_22 = arith.constant 0 : index
    %32 = vector.load %arg4[%c0_20, %c0_21, %c0_22] : memref<2x4x256xf32, #tpu.memory_space<vmem>>, vector<2x4x256xf32>
    tpu.vector_store %arg4[%c0_20, %c0_21, %c0_22], %31 {strides = array<i32>} : memref<2x4x256xf32, #tpu.memory_space<vmem>>, vector<2x4x256xf32>,
    return
  }
  func.func @transform_0(%arg0: i32) -> (i32, i32, i32) {
    %c0_i32 = arith.constant 0 : i32
    %c0_i32_0 = arith.constant 0 : i32
    %c0_i32_1 = arith.constant 0 : i32
    return %c0_i32, %arg0, %c0_i32_0 : i32, i32, i32
  }
  func.func @transform_1(%arg0: i32) -> (i32, i32, i32) {
    %c0_i32 = arith.constant 0 : i32
    %c0_i32_0 = arith.constant 0 : i32
    %c0_i32_1 = arith.constant 0 : i32
    return %c0_i32, %arg0, %c0_i32_0 : i32, i32, i32
  }
  func.func @transform_2(%arg0: i32) -> (i32, i32, i32) {
    %c0_i32 = arith.constant 0 : i32
    %c0_i32_0 = arith.constant 0 : i32
    %c0_i32_1 = arith.constant 0 : i32
    return %c0_i32, %arg0, %c0_i32_0 : i32, i32, i32
  }
  func.func @transform_3(%arg0: i32) -> (i32, i32, i32) {
    %c0_i32 = arith.constant 0 : i32
    %c0_i32_0 = arith.constant 0 : i32
    %c0_i32_1 = arith.constant 0 : i32
    return %c0_i32, %arg0, %c0_i32_0 : i32, i32, i32
  }
  func.func @transform_4(%arg0: i32) -> (i32, i32, i32) {
    %c0_i32 = arith.constant 0 : i32
    %c0_i32_0 = arith.constant 0 : i32
    %c0_i32_1 = arith.constant 0 : i32
    return %c0_i32, %arg0, %c0_i32_0 : i32, i32, i32
  }
  func.func @transform_5(%arg0: i32) -> (i32, i32, i32) {
    %c0_i32 = arith.constant 0 : i32
    %c0_i32_0 = arith.constant 0 : i32
    %c0_i32_1 = arith.constant 0 : i32
    return %c0_i32, %arg0, %c0_i32_0 : i32, i32, i32
  }
}

</mosaic_0001>

<bundles_post_ra>
// kernel: tpu_custom_call.1
= control target key start
LH: loop header
LB: loop body
LE: loop exit
PB: predicated region body
PF: predicated region fallthrough
CT: control target
= control target key end

     0   :  { %11 = vsyncpa [#allocation3], 0  ;;  %s533_s0 = inlined_call_operand.hbm [shape: f32[2,4,256], index: 0, kind: input, shape index: {}]   ;;  %s534_s1 = inlined_call_operand.hbm [shape: f32[2,4,1], index: 1, kind: input, shape index: {}]   ;;  %s535_s2 = inlined_call_operand.hbm [shape: f32[2,4,1], index: 2, kind: input, shape index: {}]   ;;  %s536_s3 = inlined_call_operand.hbm [shape: f32[2,4,256], index: 3, kind: output, shape index: {0}]   ;;  %s537_s4 = inlined_call_operand.hbm [shape: f32[1,4,1], index: 4, kind: output, shape index: {1}]   ;;  %s538_s5 = inlined_call_operand.hbm [shape: f32[1,4,1], index: 5, kind: output, shape index: {2}]  }
   0x1   :  { %12 = vsyncpa [#allocation6], 0 }
   0x2   :  { %13 = vsyncpa [#allocation4], 0 }
   0x3   :  { %14 = vsyncpa [#allocation10], 0  ;;  %s379_s18 = smov [#allocation5]   ;;  %s239_s22 = scalar_lea.hbm %s534_s1, 128 }
   0x4   :  { %s32_s19 = sshll.u32 %s379_s18, 4  ;;  %p240_p0 = scmp.ne.s32.totalorder %s534_s1, %s239_s22  ;;  %s33_s19 = int_to_ptr.vmem [resolvable:$true] %s32_s19 }
   0x5   :  { %p243_p1 = scmp.lt.u32.totalorder %s239_s22, %s534_s1 }
   0x7   :  { %p245_p2 = pnand %p243_p1, %p240_p0 }
   0x9   :  { %248 = shalt.err (!%p245_p2)
}
   0xa   :  { %s249_s27 = scalar_lea.vmem %s33_s19, 128  ;;  %p254_p4 = scmp.lt.s32.totalorder %s33_s19, %s33_s19 }
   0xb   :  { %p250_p3 = scmp.ne.s32.totalorder %s33_s19, %s249_s27  ;;  %p255_p5 = scmp.lt.s32.totalorder %s249_s27, %s249_s27 }
   0xd   :  { %p256_p6 = por %p255_p5, %p254_p4 }
   0xf   :  { %p257_p7 = pnand %p256_p6, %p250_p3 }
  0x11   :  { %260 = shalt.err (!%p257_p7)
}
  0x12   :  { %s380_s28 = smov 64   ;;  %s381_s29 = smov 4  }
  0x13   :  { %38 = dma.hbm_to_vmem [thread:$0]  %s534_s1, 128, %s33_s19, [#allocation6], %s380_s28, %s380_s28, %s381_s29  }
  0x14   :  { %s382_s7 = smov [#allocation2]   ;;  %s261_s11 = scalar_lea.hbm %s533_s0, 256 }
  0x15   :  { %s20_s8 = sshll.u32 %s382_s7, 4  ;;  %p262_p8 = scmp.ne.s32.totalorder %s533_s0, %s261_s11  ;;  %s21_s8 = int_to_ptr.vmem [resolvable:$true] %s20_s8 }
  0x16   :  { %p265_p9 = scmp.lt.u32.totalorder %s261_s11, %s533_s0 }
  0x18   :  { %p267_p10 = pnand %p265_p9, %p262_p8 }
  0x1a   :  { %270 = shalt.err (!%p267_p10)
}
  0x1b   :  { %s271_s16 = scalar_lea.vmem %s21_s8, 256  ;;  %p276_p12 = scmp.lt.s32.totalorder %s21_s8, %s21_s8 }
  0x1c   :  { %p272_p11 = scmp.ne.s32.totalorder %s21_s8, %s271_s16  ;;  %p277_p13 = scmp.lt.s32.totalorder %s271_s16, %s271_s16 }
  0x1e   :  { %p278_p0 = por %p277_p13, %p276_p12 }
  0x20   :  { %p279_p1 = pnand %p278_p0, %p272_p11 }
  0x22   :  { %282 = shalt.err (!%p279_p1)
}
  0x23   :  { %s383_s1 = smov 128   ;;  %s384_s17 = smov 8  }
  0x24   :  { %26 = dma.hbm_to_vmem [thread:$0]  %s533_s0, 256, %s21_s8, [#allocation3], %s383_s1, %s383_s1, %s384_s17  }
  0x25   :  { %s385_s20 = smov [#allocation7]   ;;  %s283_s24 = scalar_lea.hbm %s535_s2, 128 }
  0x26   :  { %s44_s21 = sshll.u32 %s385_s20, 4  ;;  %p284_p2 = scmp.ne.s32.totalorder %s535_s2, %s283_s24  ;;  %s45_s21 = int_to_ptr.vmem [resolvable:$true] %s44_s21 }
  0x27   :  { %p287_p3 = scmp.lt.u32.totalorder %s283_s24, %s535_s2 }
  0x29   :  { %p289_p4 = pnand %p287_p3, %p284_p2 }
  0x2b   :  { %292 = shalt.err (!%p289_p4)
}
  0x2c   :  { %s293_s6 = scalar_lea.vmem %s45_s21, 128  ;;  %p298_p6 = scmp.lt.s32.totalorder %s45_s21, %s45_s21 }
  0x2d   :  { %p294_p5 = scmp.ne.s32.totalorder %s45_s21, %s293_s6  ;;  %p299_p7 = scmp.lt.s32.totalorder %s293_s6, %s293_s6 }
  0x2f   :  { %p300_p8 = por %p299_p7, %p298_p6 }
  0x31   :  { %p301_p9 = pnand %p300_p8, %p294_p5 }
  0x33   :  { %304 = shalt.err (!%p301_p9)
}
  0x34   :  { %50 = dma.hbm_to_vmem [thread:$0]  %s535_s2, 128, %s45_s21, [#allocation6], %s380_s28, %s380_s28, %s381_s29  }
  0x35   :  { %371 = dma.done.wait [#allocation3], 256  }
  0x36   :  { %372 = vsyncadd [#allocation3], 4294967040 }
  0x37   :  { %373 = dma.done.wait [#allocation6], 256  }
  0x38   :  { %374 = vsyncadd [#allocation6], 4294967040  ;;  %vm68_vm0 = vcmask 1043456   ;;  %v466_v0 = vld [vmem:[#allocation2] sm:$0xff]  ;;  %v468_v1 = vld [vmem:[#allocation2 + $0x8] sm:$0xff]  ;;  %v386_v20 = vmov 0  }
  0x39   :  { %v64_v2 = vcombine.high %v466_v0, %v466_v0  ;;  %v69_v3 = vsel %vm68_vm0, %v466_v0, 0.0  ;;  %v82_v4 = vmul.f32 %v466_v0, %v466_v0  ;;  %v65_v5 = vcombine.high %v468_v1, %v468_v1  ;;  %234 = vset.pattern.permute.xlu1 %v386_v20  ;;  %233 = vset.pattern.permute.xlu0 %v386_v20  ;;  %v113_v36 = vld [vmem:[#allocation5 + $0x4] sm:$0xf]  ;;  %v112_v37 = vld [vmem:[#allocation5] sm:$0xf]  ;;  %s387_s2 = smov [#allocation9]  }
  0x3a   :  { %v74_v6 = vsel %vm68_vm0, %v468_v1, 0.0  ;;  %v83_v7 = vmul.f32 %v468_v1, %v468_v1  ;;  %vm107_vm1 = vcmask 3072   ;;  %v118_v41 = vld [vmem:[#allocation7] sm:$0xf]  ;;  %v119_v45 = vld [vmem:[#allocation7 + $0x4] sm:$0xf] }
  0x3b   :  { %v70_v8 = vsel %vm68_vm0, %v64_v2, 0.0  ;;  %v86_v9 = vcombine.high %v82_v4, %v82_v4  ;;  %v90_v10 = vsel %vm68_vm0, %v82_v4, 0.0  ;;  %v75_v11 = vsel %vm68_vm0, %v65_v5, 0.0  ;;  %s194_s28 = sshll.u32 %s387_s2, 4  ;;  %s195_s28 = int_to_ptr.vmem [resolvable:$true] %s194_s28 }
  0x3c   :  { %v71_v12 = vadd.f32 %v70_v8, %v69_v3  ;;  %v87_v13 = vcombine.high %v83_v7, %v83_v7  ;;  %v95_v15 = vsel %vm68_vm0, %v83_v7, 0.0  ;;  %v76_v17 = vadd.f32 %v75_v11, %v74_v6  ;;  %s305_s29 = scalar_lea.vmem %s195_s28, 64  ;;  %p310_p11 = scmp.lt.s32.totalorder %s195_s28, %s195_s28 }
  0x3d   :  { %v91_v14 = vsel %vm68_vm0, %v86_v9, 0.0  ;;  %p306_p10 = scmp.ne.s32.totalorder %s195_s28, %s305_s29  ;;  %p311_p12 = scmp.lt.s32.totalorder %s305_s29, %s305_s29 }
  0x3e   :  { %72 = vadd.xlane.f32.xlu0 %v71_v12  ;;  %v92_v16 = vadd.f32 %v91_v14, %v90_v10  ;;  %v96_v18 = vsel %vm68_vm0, %v87_v13, 0.0 }
  0x3f   :  { %v97_v19 = vadd.f32 %v96_v18, %v95_v15  ;;  %p312_p13 = por %p311_p12, %p310_p11 }
  0x40   :  { %93 = vadd.xlane.f32.xlu1 %v92_v16 }
  0x41   :  { %p313_p0 = pnand %p312_p13, %p306_p10 }
  0x42   :  { %77 = vadd.xlane.f32.xlu0 %v76_v17 }
  0x44   :  { %98 = vadd.xlane.f32.xlu1 %v97_v19 }
  0xcb   :  { %v73_v21 = vpop.xlane.xlu0 %72 }
  0xcc   :  { %v79_v24 = vsel %vm68_vm0, %v73_v21, 0.0 }
  0xcd   :  { %v94_v22 = vpop.xlane.xlu1 %93 }
  0xce   :  { %v100_v28 = vsel %vm68_vm0, %v94_v22, 0.0 }
  0xcf   :  { %v78_v23 = vpop.xlane.xlu0 %77 }
  0xd0   :  { %v80_v25 = vsel %vm68_vm0, %v78_v23, 0.0 }
  0xd1   :  { %v81_v26 = vadd.f32 %v80_v25, %v79_v24  ;;  %v99_v27 = vpop.xlane.xlu1 %98 }
  0xd2   :  { %v101_v29 = vsel %vm68_vm0, %v99_v27, 0.0 }
  0xd3   :  { %v103_v30 = vmul.f32 0.001953125, %v81_v26  ;;  %v102_v31 = vadd.f32 %v101_v29, %v100_v28 }
  0xd5   :  { %v104_v32 = vmul.f32 0.001953125, %v102_v31  ;;  %v105_v33 = vmul.f32 %v103_v30, %v103_v30  ;;  %108 = vst.msk [vmem:[#allocation9] sm:$0xf] %vm107_vm1, %v103_v30 }
  0xd7   :  { %v106_v34 = vsub.f32 %v104_v32, %v105_v33 }
  0xd9   :  { %v110_v35 = vadd.f32 1e-05, %v106_v34  ;;  %109 = vst.msk [vmem:[#allocation11] sm:$0xf] %vm107_vm1, %v106_v34 }
  0xdb   :  { %237 = vrsqrt.f32 %v110_v35 }
  0xe5   :  { %v238_v38 = vpop.eup %237 }
  0xe6   :  { %v115_v39 = vmul.f32 %v238_v38, %v113_v36  ;;  %v114_v40 = vmul.f32 %v238_v38, %v112_v37 }
  0xe8   :  { %128 = vperm.xlu1 %234, %v115_v39   ;;  %124 = vperm.xlu0 %233, %v114_v40   ;;  %v116_v42 = vmul.f32 %v114_v40, %v103_v30  ;;  %v117_v44 = vmul.f32 %v115_v39, %v103_v30 }
  0xea   :  { %v120_v43 = vsub.f32 %v116_v42, %v118_v41  ;;  %v121_v46 = vsub.f32 %v117_v44, %v119_v45 }
  0xec   :  { %150 = vperm.xlu1 %234, %v120_v43  }
  0xf0   :  { %154 = vperm.xlu1 %234, %v121_v46  }
  0xf1   :  { %316 = shalt.err (!%p313_p0)
}
  0xf2   :  { %s317_s10 = scalar_lea.hbm %s537_s4, 64 }
  0xf3   :  { %p318_p1 = scmp.ne.s32.totalorder %s537_s4, %s317_s10  ;;  %p321_p2 = scmp.lt.u32.totalorder %s317_s10, %s537_s4 }
  0xf5   :  { %p323_p3 = pnand %p321_p2, %p318_p1 }
  0xf7   :  { %326 = shalt.err (!%p323_p3)
}
  0xf8   :  { %197 = dma.vmem_to_hbm [thread:$0]  %s195_s28, 64, %s537_s4, [#allocation10]  }
  0xf9   :  { %s388_s18 = smov [#allocation11]  }
  0xfa   :  { %s204_s19 = sshll.u32 %s388_s18, 4  ;;  %s205_s19 = int_to_ptr.vmem [resolvable:$true] %s204_s19 }
  0xfb   :  { %s327_s20 = scalar_lea.vmem %s205_s19, 64  ;;  %p332_p5 = scmp.lt.s32.totalorder %s205_s19, %s205_s19 }
  0xfc   :  { %p328_p4 = scmp.ne.s32.totalorder %s205_s19, %s327_s20  ;;  %p333_p6 = scmp.lt.s32.totalorder %s327_s20, %s327_s20 }
  0xfe   :  { %p334_p7 = por %p333_p6, %p332_p5 }
 0x100   :  { %p335_p8 = pnand %p334_p7, %p328_p4 }
 0x102   :  { %338 = shalt.err (!%p335_p8)
}
 0x103   :  { %s339_s23 = scalar_lea.hbm %s538_s5, 64 }
 0x104   :  { %p340_p9 = scmp.ne.s32.totalorder %s538_s5, %s339_s23  ;;  %p343_p10 = scmp.lt.u32.totalorder %s339_s23, %s538_s5 }
 0x106   :  { %p345_p11 = pnand %p343_p10, %p340_p9 }
 0x108   :  { %348 = shalt.err (!%p345_p11)
}
 0x109   :  { %207 = dma.vmem_to_hbm [thread:$0]  %s205_s19, 64, %s538_s5, [#allocation10]   ;;  %v389_v47 = vmov 839922192   ;;  %v133_v49 = vlaneseq }
 0x10a   :  { %v131_v48 = vunpack.c.l.s4 %v389_v47  ;;  %s390_s6 = smov [#allocation8]  }
 0x10b   :  { %v134_v51 = vshrl.u32 %v133_v49, 7  ;;  %s181_s0 = sshll.u32 %s390_s6, 4  ;;  %s182_s0 = int_to_ptr.vmem [resolvable:$true] %s181_s0 }
 0x10c   :  { %v132_v50 = vunpack.c.0.s8 %v131_v48  ;;  %s349_s5 = scalar_lea.vmem %s182_s0, 256  ;;  %p354_p13 = scmp.lt.s32.totalorder %s182_s0, %s182_s0 }
 0x10d   :  { %p350_p12 = scmp.ne.s32.totalorder %s182_s0, %s349_s5  ;;  %p355_p0 = scmp.lt.s32.totalorder %s349_s5, %s349_s5 }
 0x10e   :  { %v135_v52 = vsub.s32 %v132_v50, %v134_v51 }
 0x10f   :  { %p356_p1 = por %p355_p0, %p354_p13 }
 0x111   :  { %p357_p2 = pnand %p356_p1, %p350_p12 }
 0x167   :  { %v129_v53 = vpop.permute.xlu1 %128  ;;  %v125_v54 = vpop.permute.xlu0 %124 }
 0x168   :  { %v136_v55 = vrot.slane %v125_v54, %v135_v52  ;;  %v143_v57 = vrot.slane %v129_v53, %v135_v52 }
 0x16a   :  { %v146_v58 = vmul.f32 %v136_v55, %v466_v0  ;;  %v147_v62 = vmul.f32 %v143_v57, %v468_v1 }
 0x16b   :  { %v151_v56 = vpop.permute.xlu1 %150 }
 0x16c   :  { %v162_v59 = vrot.slane %v151_v56, %v135_v52 }
 0x16e   :  { %v172_v60 = vsub.f32 %v146_v58, %v162_v59 }
 0x16f   :  { %v155_v61 = vpop.permute.xlu1 %154 }
 0x170   :  { %174 = vst [vmem:[#allocation8] sm:$0xff] %v172_v60  ;;  %v169_v63 = vrot.slane %v155_v61, %v135_v52 }
 0x172   :  { %v173_v2 = vsub.f32 %v147_v62, %v169_v63 }
 0x174   :  { %175 = vst [vmem:[#allocation8 + $0x8] sm:$0xff] %v173_v2 }
 0x175   :  { %360 = shalt.err (!%p357_p2)
}
 0x176   :  { %s361_s28 = scalar_lea.hbm %s536_s3, 256 }
 0x177   :  { %p362_p3 = scmp.ne.s32.totalorder %s536_s3, %s361_s28  ;;  %p365_p4 = scmp.lt.u32.totalorder %s361_s28, %s536_s3 }
 0x179   :  { %p367_p5 = pnand %p365_p4, %p362_p3 }
 0x17b   :  { %370 = shalt.err (!%p367_p5)
}
 0x17c   :  { %187 = dma.vmem_to_hbm [thread:$0]  %s182_s0, 256, %s536_s3, [#allocation4], %s383_s1, %s383_s1, %s384_s17  }
 0x17d   :  { %375 = dma.done.wait [#allocation4], 256  }
 0x17e   :  { %376 = vsyncadd [#allocation4], 4294967040 }
 0x17f   :  { %377 = dma.done.wait [#allocation10], 128  }
 0x180   :  { %378 = vsyncadd [#allocation10], 4294967168 }
 0x181   :  { %217 = vsyncpa [#allocation3], 1 }
 0x182   :  { %218 = vsyncpa [#allocation6], 1 }
 0x183   :  { %219 = vsyncpa [#allocation4], 1 }
 0x184   :  { %220 = vsyncpa [#allocation10], 1 }

</bundles_post_ra>
